<compile_context>
chip_gen: v6e
topology: v6e:2x2x1
jax: 0.10.0
libtpu: 0.0.40
codegen_flags: <defaults>
</compile_context>

<pallas_src>
import numpy as np
import jax
import jax.numpy as jnp
from jax.experimental import pallas as pl
from jax.experimental.pallas import tpu as pltpu

# ----- logical (unpadded) sizes, consistent with a tiny BatchMolGraph -----
ATOM_FDIM = 16
BOND_FDIM = 24
HIDDEN = 32
DEPTH = 3            # args.depth
NUM_ATOMS = 16       # includes chemprop padding atom 0
NUM_BONDS = 32       # includes chemprop padding bond 0
NUM_GRAPHS = 8       # graphs batched under one pallas_call grid

# ----- padded (lane-dense) sizes used inside the kernel -----
FEAT_PAD = 128       # lane width for every feature axis (atom/bond/hidden)
ATOMS_PAD = 16       # == NUM_ATOMS, multiple of 8 sublanes
BONDS_PAD = 32       # == NUM_BONDS, multiple of 8 sublanes (shrunk from 128)


def mpn_kernel(f_atoms_ref, f_bonds_ref, M_ref, A_ref,
               Wi_ref, Wh_ref, Wo_a_ref, Wo_m_ref, bo_ref, out_ref):
    # input = W_i(f_bonds); message = ReLU(input)      (bias=False on W_i)
    inp = jnp.dot(f_bonds_ref[...], Wi_ref[...],
                  preferred_element_type=jnp.float32)
    message = jnp.maximum(inp, 0.0)

    # fused selection operator (S_b2a @ A_a2b - S_b2rev), bonds x bonds, bf16;
    # loaded once before the unrolled loop, as is W_h.
    M = M_ref[...]
    Wh = Wh_ref[...]

    # message passing: DEPTH-1 statically unrolled steps, 2 MXU matmuls each
    for _ in range(DEPTH - 1):
        msg_agg = jnp.dot(M, message.astype(jnp.bfloat16),
                          preferred_element_type=jnp.float32)
        message = jnp.maximum(
            inp + jnp.dot(msg_agg.astype(jnp.bfloat16), Wh,
                          preferred_element_type=jnp.float32), 0.0)

    # readout: a_message = index_select_ND(message, a2b).sum(1) == A_a2b @ msg
    a_message = jnp.dot(A_ref[...], message.astype(jnp.bfloat16),
                        preferred_element_type=jnp.float32)
    # concat-free W_o: ReLU(f_atoms @ Wo_atom + a_message @ Wo_msg + b_o)
    out = jnp.dot(f_atoms_ref[...], Wo_a_ref[...],
                  preferred_element_type=jnp.float32)
    out = out + jnp.dot(a_message.astype(jnp.bfloat16), Wo_m_ref[...],
                        preferred_element_type=jnp.float32)
    out_ref[...] = jnp.maximum(out + bo_ref[...], 0.0)


def mpn_encoder_batched(f_atoms_b, f_bonds_b, M_b, A_b,
                        Wi_p, Wh_p, Wo_a_p, Wo_m_p, bo_p):
    G = f_atoms_b.shape[0]

    def per_graph(rows, cols):
        # streamed per grid step; leading graph dim squeezed out of the block
        return pl.BlockSpec((None, rows, cols), lambda g: (g, 0, 0))

    def resident(rows, cols):
        # constant index_map: DMA'd once, stays VMEM-resident across the grid
        return pl.BlockSpec((rows, cols), lambda g: (0, 0))

    return pl.pallas_call(
        mpn_kernel,
        out_shape=jax.ShapeDtypeStruct((G, ATOMS_PAD, FEAT_PAD), jnp.float32),
        grid=(G,),
        in_specs=[
            per_graph(ATOMS_PAD, FEAT_PAD),    # f_atoms   (bf16)
            per_graph(BONDS_PAD, FEAT_PAD),    # f_bonds   (bf16)
            per_graph(BONDS_PAD, BONDS_PAD),   # M         (bf16)
            per_graph(ATOMS_PAD, BONDS_PAD),   # A_a2b     (bf16)
            resident(FEAT_PAD, FEAT_PAD),      # W_i       (bf16)
            resident(FEAT_PAD, FEAT_PAD),      # W_h       (bf16)
            resident(FEAT_PAD, FEAT_PAD),      # W_o atom half (bf16)
            resident(FEAT_PAD, FEAT_PAD),      # W_o message half (bf16)
            resident(ATOMS_PAD, FEAT_PAD),     # b_o broadcast over atom rows (f32)
        ],
        out_specs=per_graph(ATOMS_PAD, FEAT_PAD),
        compiler_params=pltpu.CompilerParams(
            # graph axis is embarrassingly parallel -> megacore split on v7x,
            # pipelined grid on all generations.
            dimension_semantics=("parallel",),
            # TODO(synk): when tiles grow for production sizes, set
            # vmem_limit_bytes per generation (~48-56 MiB on v7x, ~100 MiB on
            # v5e/v6e); at this footprint (<1 MiB) the default is plenty.
        ),
    )(f_atoms_b, f_bonds_b, M_b, A_b, Wi_p, Wh_p, Wo_a_p, Wo_m_p, bo_p)


def reference_forward(f_atoms, f_bonds, a2b, b2a, b2revb, Wi, Wh, Wo, bo):
    """Pure-JAX f32 replica of the PyTorch forward (actual gathers)."""
    inp = f_bonds @ Wi
    message = jnp.maximum(inp, 0.0)
    for _ in range(DEPTH - 1):
        nei = message[a2b]                 # (A, max_nb, H)
        a_message = nei.sum(axis=1)
        rev = message[b2revb]
        message = a_message[b2a] - rev
        message = message @ Wh
        message = jnp.maximum(inp + message, 0.0)
    a_message = message[a2b].sum(axis=1)
    a_input = jnp.concatenate([f_atoms, a_message], axis=1)
    return jnp.maximum(a_input @ Wo + bo, 0.0)


def build_graph(seed):
    """Synthetic BatchMolGraph-like index structures (index 0 = padding)."""
    rng = np.random.default_rng(seed)
    src = np.zeros(NUM_BONDS, dtype=np.int32)
    tgt = np.zeros(NUM_BONDS, dtype=np.int32)
    b2revb = np.zeros(NUM_BONDS, dtype=np.int32)
    for k in range(15):                      # 15 reverse-paired directed bonds
        b1, b2 = 2 * k + 1, 2 * k + 2
        a1 = int(rng.integers(1, NUM_ATOMS))
        a2 = int(rng.integers(1, NUM_ATOMS))
        src[b1], tgt[b1] = a1, a2
        src[b2], tgt[b2] = a2, a1
        b2revb[b1], b2revb[b2] = b2, b1
    src[31] = int(rng.integers(1, NUM_ATOMS))
    tgt[31] = int(rng.integers(1, NUM_ATOMS))
    b2revb[31] = 31
    b2a = src.copy()

    # a2b: incoming bonds of each atom, zero-padded to max in-degree
    incoming = [[b for b in range(1, NUM_BONDS) if tgt[b] == a]
                for a in range(NUM_ATOMS)]
    max_nb = max(1, max(len(x) for x in incoming))
    a2b = np.zeros((NUM_ATOMS, max_nb), dtype=np.int32)
    for a, bonds in enumerate(incoming):
        a2b[a, :len(bonds)] = bonds

    # dense operators equivalent to the gathers (incl. padding-slot counts;
    # exact because message[0] stays exactly zero)
    A_a2b = np.zeros((NUM_ATOMS, NUM_BONDS), dtype=np.float32)
    for a in range(NUM_ATOMS):
        for k in range(max_nb):
            A_a2b[a, a2b[a, k]] += 1.0
    S_b2a = np.zeros((NUM_BONDS, NUM_ATOMS), dtype=np.float32)
    S_b2a[np.arange(NUM_BONDS), b2a] = 1.0
    S_b2rev = np.zeros((NUM_BONDS, NUM_BONDS), dtype=np.float32)
    S_b2rev[np.arange(NUM_BONDS), b2revb] = 1.0
    M = S_b2a @ A_a2b - S_b2rev              # fused per-depth selection op

    a_scope = [(1, 8), (9, 7)]               # 2 molecules over the 15 real atoms
    return a2b, b2a, b2revb, A_a2b, M, a_scope


def pad2(x, rows, cols):
    out = np.zeros((rows, cols), dtype=np.float32)
    out[:x.shape[0], :x.shape[1]] = x
    return out


if __name__ == "__main__":
    key = jax.random.PRNGKey(0)
    k_w, k_feat = jax.random.split(key)
    k_wi, k_wh, k_wo, k_bo = jax.random.split(k_w, 4)

    def uinit(k, shape, fan_in):
        b = 1.0 / np.sqrt(fan_in)
        return jax.random.uniform(k, shape, jnp.float32, -b, b)

    # weights stored already transposed (in_features, out_features);
    # W_i / W_h have bias=False, W_o has bias.
    Wi = uinit(k_wi, (BOND_FDIM, HIDDEN), BOND_FDIM)
    Wh = uinit(k_wh, (HIDDEN, HIDDEN), HIDDEN)
    Wo = uinit(k_wo, (ATOM_FDIM + HIDDEN, HIDDEN), ATOM_FDIM + HIDDEN)
    bo = uinit(k_bo, (1, HIDDEN), ATOM_FDIM + HIDDEN)

    # ---- per-graph synthetic BatchMolGraphs + features ----
    graphs = [build_graph(seed=g) for g in range(NUM_GRAPHS)]
    feat_keys = jax.random.split(k_feat, NUM_GRAPHS)

    f_atoms_b = np.zeros((NUM_GRAPHS, ATOMS_PAD, FEAT_PAD), np.float32)
    f_bonds_b = np.zeros((NUM_GRAPHS, BONDS_PAD, FEAT_PAD), np.float32)
    M_b = np.zeros((NUM_GRAPHS, BONDS_PAD, BONDS_PAD), np.float32)
    A_b = np.zeros((NUM_GRAPHS, ATOMS_PAD, BONDS_PAD), np.float32)
    f_atoms_list, f_bonds_list = [], []
    for g in range(NUM_GRAPHS):
        k_fa, k_fb = jax.random.split(feat_keys[g])
        fa = jax.random.normal(k_fa, (NUM_ATOMS, ATOM_FDIM), jnp.float32)
        fb = jax.random.normal(k_fb, (NUM_BONDS, BOND_FDIM), jnp.float32)
        fa = fa.at[0].set(0.0)               # padding rows are exact zeros
        fb = fb.at[0].set(0.0)
        f_atoms_list.append(fa)
        f_bonds_list.append(fb)
        _, _, _, A_a2b, M, _ = graphs[g]
        f_atoms_b[g, :NUM_ATOMS, :ATOM_FDIM] = np.asarray(fa)
        f_bonds_b[g, :NUM_BONDS, :BOND_FDIM] = np.asarray(fb)
        M_b[g] = M
        A_b[g] = A_a2b

    Wo_np = np.asarray(Wo)
    bo_full = np.zeros((ATOMS_PAD, FEAT_PAD), np.float32)
    bo_full[:, :HIDDEN] = np.asarray(bo)     # bias broadcast over atom rows

    # bf16 matmul operands (M/A entries are small integers -> exact in bf16);
    # bias stays f32 (added after the f32-accumulated dots).
    to_bf16 = lambda x: jnp.asarray(x, dtype=jnp.bfloat16)
    atom_hiddens_p = mpn_encoder_batched(
        to_bf16(f_atoms_b), to_bf16(f_bonds_b), to_bf16(M_b), to_bf16(A_b),
        to_bf16(pad2(np.asarray(Wi), FEAT_PAD, FEAT_PAD)),
        to_bf16(pad2(np.asarray(Wh), FEAT_PAD, FEAT_PAD)),
        to_bf16(pad2(Wo_np[:ATOM_FDIM], FEAT_PAD, FEAT_PAD)),
        to_bf16(pad2(Wo_np[ATOM_FDIM:], FEAT_PAD, FEAT_PAD)),
        jnp.asarray(bo_full))
    jax.block_until_ready(atom_hiddens_p)

    # single device->host transfer, then per-molecule narrow() over a_scope
    # (host-side numpy slices; no per-molecule device ops)
    out_host = np.asarray(atom_hiddens_p)
    mol_vecs = []
    for g in range(NUM_GRAPHS):
        a_scope = graphs[g][5]
        ah = out_host[g, :NUM_ATOMS, :HIDDEN]
        mol_vecs.append([ah[a_start:a_start + a_size]
                         for a_start, a_size in a_scope])

    # f32 pure-JAX reference with the actual gathers
    refs = []
    for g in range(NUM_GRAPHS):
        a2b, b2a, b2revb, _, _, _ = graphs[g]
        refs.append(reference_forward(
            f_atoms_list[g], f_bonds_list[g],
            jnp.asarray(a2b), jnp.asarray(b2a), jnp.asarray(b2revb),
            Wi, Wh, Wo, bo))
    ref = np.stack([np.asarray(r) for r in refs])

    # tolerance relaxed because operands are bf16 (f32 accumulate), per review
    np.testing.assert_allclose(out_host[:, :NUM_ATOMS, :HIDDEN], ref,
                               rtol=5e-2, atol=5e-2)
    # padded feature lanes of the kernel output must be exactly zero
    assert float(np.abs(out_host[:, :, HIDDEN:]).max()) == 0.0
    print("KERNEL_OK")
</pallas_src>

<mosaic_0001>
module attributes {stable_mosaic.version = 11 : i64} {
  func.func @mpn_kernel(%arg0: i32, %arg1: memref<1x16x128xbf16, #tpu.memory_space<vmem>>, %arg2: memref<1x32x128xbf16, #tpu.memory_space<vmem>>, %arg3: memref<1x32x32xbf16, #tpu.memory_space<vmem>>, %arg4: memref<1x16x32xbf16, #tpu.memory_space<vmem>>, %arg5: memref<128x128xbf16, #tpu.memory_space<vmem>>, %arg6: memref<128x128xbf16, #tpu.memory_space<vmem>>, %arg7: memref<128x128xbf16, #tpu.memory_space<vmem>>, %arg8: memref<128x128xbf16, #tpu.memory_space<vmem>>, %arg9: memref<16x128xf32, #tpu.memory_space<vmem>>, %arg10: memref<1x16x128xf32, #tpu.memory_space<vmem>>) attributes {dimension_semantics = [#tpu.dimension_semantics<parallel>], iteration_bounds = array<i64: 8>, scalar_prefetch = 0 : i64, scratch_operands = 0 : i64, tpu.core_type = #tpu.core_type<tc>, window_params = [{transform_indices = @transform_0, window_bounds = array<i64: 1, 16, 128>}, {transform_indices = @transform_1, window_bounds = array<i64: 1, 32, 128>}, {transform_indices = @transform_2, window_bounds = array<i64: 1, 32, 32>}, {transform_indices = @transform_3, window_bounds = array<i64: 1, 16, 32>}, {pipeline_mode = #tpu.pipeline_mode<synchronous>, transform_indices = @transform_4, window_bounds = array<i64: 128, 128>}, {pipeline_mode = #tpu.pipeline_mode<synchronous>, transform_indices = @transform_5, window_bounds = array<i64: 128, 128>}, {pipeline_mode = #tpu.pipeline_mode<synchronous>, transform_indices = @transform_6, window_bounds = array<i64: 128, 128>}, {pipeline_mode = #tpu.pipeline_mode<synchronous>, transform_indices = @transform_7, window_bounds = array<i64: 128, 128>}, {pipeline_mode = #tpu.pipeline_mode<synchronous>, transform_indices = @transform_8, window_bounds = array<i64: 16, 128>}, {transform_indices = @transform_9, window_bounds = array<i64: 1, 16, 128>}]} {
    %c0 = arith.constant 0 : index
    %c0_0 = arith.constant 0 : index
    %c0_1 = arith.constant 0 : index
    %0 = vector.load %arg2[%c0, %c0_0, %c0_1] : memref<1x32x128xbf16, #tpu.memory_space<vmem>>, vector<1x32x128xbf16>
    %1 = vector.shape_cast %0 : vector<1x32x128xbf16> to vector<32x128xbf16>
    %c0_2 = arith.constant 0 : index
    %c0_3 = arith.constant 0 : index
    %2 = vector.load %arg5[%c0_2, %c0_3] : memref<128x128xbf16, #tpu.memory_space<vmem>>, vector<128x128xbf16>
    %cst = arith.constant dense<0.000000e+00> : vector<32x128xf32>
    %3 = tpu.matmul %1, %2, %cst {dimension_numbers = #tpu.dot_dimension_numbers<[1], [0], [0], [1], [0, 0, 1, 1], [], []>} : vector<32x128xbf16>, vector<128x128xbf16>, vector<32x128xf32> -> vector<32x128xf32>
    %cst_4 = arith.constant 0.000000e+00 : f32
    %4 = vector.broadcast %cst_4 : f32 to vector<32x128xf32>
    %5 = arith.maximumf %3, %4 : vector<32x128xf32>
    %c0_5 = arith.constant 0 : index
    %c0_6 = arith.constant 0 : index
    %c0_7 = arith.constant 0 : index
    %6 = vector.load %arg3[%c0_5, %c0_6, %c0_7] : memref<1x32x32xbf16, #tpu.memory_space<vmem>>, vector<1x32x32xbf16>
    %7 = vector.shape_cast %6 : vector<1x32x32xbf16> to vector<32x32xbf16>
    %c0_8 = arith.constant 0 : index
    %c0_9 = arith.constant 0 : index
    %8 = vector.load %arg6[%c0_8, %c0_9] : memref<128x128xbf16, #tpu.memory_space<vmem>>, vector<128x128xbf16>
    %9 = arith.truncf %5 : vector<32x128xf32> to vector<32x128xbf16>
    %cst_10 = arith.constant dense<0.000000e+00> : vector<32x128xf32>
    %10 = tpu.matmul %7, %9, %cst_10 {dimension_numbers = #tpu.dot_dimension_numbers<[1], [0], [0], [1], [0, 0, 1, 1], [], []>} : vector<32x32xbf16>, vector<32x128xbf16>, vector<32x128xf32> -> vector<32x128xf32>
    %11 = arith.truncf %10 : vector<32x128xf32> to vector<32x128xbf16>
    %cst_11 = arith.constant dense<0.000000e+00> : vector<32x128xf32>
    %12 = tpu.matmul %11, %8, %cst_11 {dimension_numbers = #tpu.dot_dimension_numbers<[1], [0], [0], [1], [0, 0, 1, 1], [], []>} : vector<32x128xbf16>, vector<128x128xbf16>, vector<32x128xf32> -> vector<32x128xf32>
    %13 = arith.addf %3, %12 : vector<32x128xf32>
    %cst_12 = arith.constant 0.000000e+00 : f32
    %14 = vector.broadcast %cst_12 : f32 to vector<32x128xf32>
    %15 = arith.maximumf %13, %14 : vector<32x128xf32>
    %16 = arith.truncf %15 : vector<32x128xf32> to vector<32x128xbf16>
    %cst_13 = arith.constant dense<0.000000e+00> : vector<32x128xf32>
    %17 = tpu.matmul %7, %16, %cst_13 {dimension_numbers = #tpu.dot_dimension_numbers<[1], [0], [0], [1], [0, 0, 1, 1], [], []>} : vector<32x32xbf16>, vector<32x128xbf16>, vector<32x128xf32> -> vector<32x128xf32>
    %18 = arith.truncf %17 : vector<32x128xf32> to vector<32x128xbf16>
    %cst_14 = arith.constant dense<0.000000e+00> : vector<32x128xf32>
    %19 = tpu.matmul %18, %8, %cst_14 {dimension_numbers = #tpu.dot_dimension_numbers<[1], [0], [0], [1], [0, 0, 1, 1], [], []>} : vector<32x128xbf16>, vector<128x128xbf16>, vector<32x128xf32> -> vector<32x128xf32>
    %20 = arith.addf %3, %19 : vector<32x128xf32>
    %cst_15 = arith.constant 0.000000e+00 : f32
    %21 = vector.broadcast %cst_15 : f32 to vector<32x128xf32>
    %22 = arith.maximumf %20, %21 : vector<32x128xf32>
    %c0_16 = arith.constant 0 : index
    %c0_17 = arith.constant 0 : index
    %c0_18 = arith.constant 0 : index
    %23 = vector.load %arg4[%c0_16, %c0_17, %c0_18] : memref<1x16x32xbf16, #tpu.memory_space<vmem>>, vector<1x16x32xbf16>
    %24 = vector.shape_cast %23 : vector<1x16x32xbf16> to vector<16x32xbf16>
    %25 = arith.truncf %22 : vector<32x128xf32> to vector<32x128xbf16>
    %cst_19 = arith.constant dense<0.000000e+00> : vector<16x128xf32>
    %26 = tpu.matmul %24, %25, %cst_19 {dimension_numbers = #tpu.dot_dimension_numbers<[1], [0], [0], [1], [0, 0, 1, 1], [], []>} : vector<16x32xbf16>, vector<32x128xbf16>, vector<16x128xf32> -> vector<16x128xf32>
    %c0_20 = arith.constant 0 : index
    %c0_21 = arith.constant 0 : index
    %c0_22 = arith.constant 0 : index
    %27 = vector.load %arg1[%c0_20, %c0_21, %c0_22] : memref<1x16x128xbf16, #tpu.memory_space<vmem>>, vector<1x16x128xbf16>
    %28 = vector.shape_cast %27 : vector<1x16x128xbf16> to vector<16x128xbf16>
    %c0_23 = arith.constant 0 : index
    %c0_24 = arith.constant 0 : index
    %29 = vector.load %arg7[%c0_23, %c0_24] : memref<128x128xbf16, #tpu.memory_space<vmem>>, vector<128x128xbf16>
    %cst_25 = arith.constant dense<0.000000e+00> : vector<16x128xf32>
    %30 = tpu.matmul %28, %29, %cst_25 {dimension_numbers = #tpu.dot_dimension_numbers<[1], [0], [0], [1], [0, 0, 1, 1], [], []>} : vector<16x128xbf16>, vector<128x128xbf16>, vector<16x128xf32> -> vector<16x128xf32>
    %31 = arith.truncf %26 : vector<16x128xf32> to vector<16x128xbf16>
    %c0_26 = arith.constant 0 : index
    %c0_27 = arith.constant 0 : index
    %32 = vector.load %arg8[%c0_26, %c0_27] : memref<128x128xbf16, #tpu.memory_space<vmem>>, vector<128x128xbf16>
    %cst_28 = arith.constant dense<0.000000e+00> : vector<16x128xf32>
    %33 = tpu.matmul %31, %32, %cst_28 {dimension_numbers = #tpu.dot_dimension_numbers<[1], [0], [0], [1], [0, 0, 1, 1], [], []>} : vector<16x128xbf16>, vector<128x128xbf16>, vector<16x128xf32> -> vector<16x128xf32>
    %34 = arith.addf %30, %33 : vector<16x128xf32>
    %c0_29 = arith.constant 0 : index
    %c0_30 = arith.constant 0 : index
    %35 = vector.load %arg9[%c0_29, %c0_30] : memref<16x128xf32, #tpu.memory_space<vmem>>, vector<16x128xf32>
    %36 = arith.addf %34, %35 : vector<16x128xf32>
    %cst_31 = arith.constant 0.000000e+00 : f32
    %37 = vector.broadcast %cst_31 : f32 to vector<16x128xf32>
    %38 = arith.maximumf %36, %37 : vector<16x128xf32>
    %c0_32 = arith.constant 0 : index
    %c0_33 = arith.constant 0 : index
    %c0_34 = arith.constant 0 : index
    %39 = vector.load %arg10[%c0_32, %c0_33, %c0_34] : memref<1x16x128xf32, #tpu.memory_space<vmem>>, vector<1x16x128xf32>
    %40 = vector.shape_cast %39 : vector<1x16x128xf32> to vector<16x128xf32>
    %41 = vector.shape_cast %38 : vector<16x128xf32> to vector<1x16x128xf32>
    tpu.vector_store %arg10[%c0_32, %c0_33, %c0_34], %41 {strides = array<i32>} : memref<1x16x128xf32, #tpu.memory_space<vmem>>, vector<1x16x128xf32>,
    return
  }
  func.func @transform_0(%arg0: i32) -> (i32, i32, i32) {
    %c0_i32 = arith.constant 0 : i32
    %c0_i32_0 = arith.constant 0 : i32
    %c0_i32_1 = arith.constant 0 : i32
    return %arg0, %c0_i32, %c0_i32_0 : i32, i32, i32
  }
  func.func @transform_1(%arg0: i32) -> (i32, i32, i32) {
    %c0_i32 = arith.constant 0 : i32
    %c0_i32_0 = arith.constant 0 : i32
    %c0_i32_1 = arith.constant 0 : i32
    return %arg0, %c0_i32, %c0_i32_0 : i32, i32, i32
  }
  func.func @transform_2(%arg0: i32) -> (i32, i32, i32) {
    %c0_i32 = arith.constant 0 : i32
    %c0_i32_0 = arith.constant 0 : i32
    %c0_i32_1 = arith.constant 0 : i32
    return %arg0, %c0_i32, %c0_i32_0 : i32, i32, i32
  }
  func.func @transform_3(%arg0: i32) -> (i32, i32, i32) {
    %c0_i32 = arith.constant 0 : i32
    %c0_i32_0 = arith.constant 0 : i32
    %c0_i32_1 = arith.constant 0 : i32
    return %arg0, %c0_i32, %c0_i32_0 : i32, i32, i32
  }
  func.func @transform_4(%arg0: i32) -> (i32, i32) {
    %c0_i32 = arith.constant 0 : i32
    %c0_i32_0 = arith.constant 0 : i32
    %c0_i32_1 = arith.constant 0 : i32
    return %c0_i32, %c0_i32_0 : i32, i32
  }
  func.func @transform_5(%arg0: i32) -> (i32, i32) {
    %c0_i32 = arith.constant 0 : i32
    %c0_i32_0 = arith.constant 0 : i32
    %c0_i32_1 = arith.constant 0 : i32
    return %c0_i32, %c0_i32_0 : i32, i32
  }
  func.func @transform_6(%arg0: i32) -> (i32, i32) {
    %c0_i32 = arith.constant 0 : i32
    %c0_i32_0 = arith.constant 0 : i32
    %c0_i32_1 = arith.constant 0 : i32
    return %c0_i32, %c0_i32_0 : i32, i32
  }
  func.func @transform_7(%arg0: i32) -> (i32, i32) {
    %c0_i32 = arith.constant 0 : i32
    %c0_i32_0 = arith.constant 0 : i32
    %c0_i32_1 = arith.constant 0 : i32
    return %c0_i32, %c0_i32_0 : i32, i32
  }
  func.func @transform_8(%arg0: i32) -> (i32, i32) {
    %c0_i32 = arith.constant 0 : i32
    %c0_i32_0 = arith.constant 0 : i32
    %c0_i32_1 = arith.constant 0 : i32
    return %c0_i32, %c0_i32_0 : i32, i32
  }
  func.func @transform_9(%arg0: i32) -> (i32, i32, i32) {
    %c0_i32 = arith.constant 0 : i32
    %c0_i32_0 = arith.constant 0 : i32
    %c0_i32_1 = arith.constant 0 : i32
    return %arg0, %c0_i32, %c0_i32_0 : i32, i32, i32
  }
}

</mosaic_0001>

<bundles_post_ra>
// kernel: tpu_custom_call.1
= control target key start
LH: loop header
LB: loop body
LE: loop exit
PB: predicated region body
PF: predicated region fallthrough
CT: control target
= control target key end

     0   :  { %s2734_s0 = inlined_call_operand.hbm [shape: bf16[8,16,128], index: 0, kind: input, shape index: {}]   ;;  %s2735_s1 = inlined_call_operand.hbm [shape: bf16[8,32,128], index: 1, kind: input, shape index: {}]   ;;  %s2736_s2 = inlined_call_operand.hbm [shape: bf16[8,32,32], index: 2, kind: input, shape index: {}]   ;;  %s2737_s3 = inlined_call_operand.hbm [shape: bf16[8,16,32], index: 3, kind: input, shape index: {}]   ;;  %s2738_s4 = inlined_call_operand.hbm [shape: bf16[128,128], index: 4, kind: input, shape index: {}]   ;;  %s2739_s5 = inlined_call_operand.hbm [shape: bf16[128,128], index: 5, kind: input, shape index: {}]   ;;  %s2740_s6 = inlined_call_operand.hbm [shape: bf16[128,128], index: 6, kind: input, shape index: {}]   ;;  %s2741_s7 = inlined_call_operand.hbm [shape: bf16[128,128], index: 7, kind: input, shape index: {}]   ;;  %s2742_s8 = inlined_call_operand.hbm [shape: f32[16,128], index: 8, kind: input, shape index: {}]   ;;  %s2743_s9 = inlined_call_operand.hbm [shape: f32[8,16,128], index: 9, kind: output, shape index: {}]  }
   0x1   :  { %2769 = sst [smem:[#allocation32_spill]] %s2735_s1 }
   0x2   :  { %2770 = sst [smem:[#allocation33_spill]] %s2738_s4 }
   0x3   :  { %2771 = sst [smem:[#allocation34_spill]] %s2739_s5 }
   0x4   :  { %2772 = sst [smem:[#allocation35_spill]] %s2741_s7 }
   0x5   :  { %2773 = sst [smem:[#allocation36_spill]] %s2743_s9 }
   0x6   :  { %14 = vsyncpa [#allocation3], 0 }
   0x7   :  { %16 = vsyncpa [#allocation3 + $0x1], 0 }
   0x8   :  { %17 = vsyncpa [#allocation6], 0 }
   0x9   :  { %19 = vsyncpa [#allocation6 + $0x1], 0 }
   0xa   :  { %20 = vsyncpa [#allocation9], 0 }
   0xb   :  { %22 = vsyncpa [#allocation9 + $0x1], 0 }
   0xc   :  { %23 = vsyncpa [#allocation12], 0 }
   0xd   :  { %24 = vsyncpa [#allocation15], 0 }
   0xe   :  { %25 = vsyncpa [#allocation4], 0 }
   0xf   :  { %27 = vsyncpa [#allocation4 + $0x1], 0  ;;  %s2280_s30 = smov 0   ;;  %s2282_s10 = smov 0  }
  0x10   :  { %s2284_s11 = smov 0   ;;  %s2286_s12 = smov 0  }
  0x11 LB: > { %2774 = sst [smem:[#allocation25_spill]] %s2198_s30  ;;  %s2212_s13 = smov [#allocation10]   ;;  %s2210_s12 = sphi %s2286_s12, %s2815_s12   ;;  %s2206_s11 = sphi %s2284_s11, %s2817_s11   ;;  %s2202_s10 = sphi %s2282_s10, %s2819_s10   ;;  %s2198_s30 = sphi %s2280_s30, %s2818_s30  }
  0x12   : > { %2775 = sst [smem:[#allocation26_spill]] %s2206_s11  ;;  %s285_s14 = sshll.u32 %s2212_s13, 4  ;;  %s286_s14 = int_to_ptr.vmem [resolvable:$true] %s285_s14 }
  0x13   : > { %s2301_s15 = sadd.s32 4294967295, %s2210_s12   ;;  %p1460_p0 = scmp.ge.s32.totalorder %s2210_s12, 1 }
  0x14   : > { %2776 = sst [smem:[#allocation27_spill]] %s2301_s15  ;;  %p2751_p1 = scmp.eq.s32.totalorder %s2301_s15, 0 }
  0x15   : > { %p260_p2 = scmp.eq.s32.totalorder %s2301_s15, 7  ;;  %p273_p3 = scmp.lt.s32.totalorder %s2210_s12, 9 }
  0x16   : > { %s2213_s17 = smov [#allocation11]   ;;  %s2214_s20 = smov [#allocation14]  }
  0x17   : > { %p2307_p4 = pnand %p1460_p0, %p273_p3  ;;  %s298_s18 = sshll.u32 %s2213_s17, 4  ;;  %s2313_s18 = int_to_ptr.vmem [resolvable:$true] %s298_s18 }
  0x18   : > { %s324_s21 = sshll.u32 %s2214_s20, 4  ;;  %s1895_s23 = scalar_lea.vmem %s286_s14, 1024  ;;  %s2321_s21 = int_to_ptr.vmem [resolvable:$true] %s324_s21 }
  0x19   : > { %s2777_s16 = scalar_select %p2307_p4, 1, 0 }
  0x1a   : > { %p1756_p5 = pneg %p2307_p4  ;;  %p1896_p8 = scmp.ne.s32.totalorder %s286_s14, %s1895_s23 }
  0x1b   : > { %p1903_p11 = scmp.lt.s32.totalorder %s286_s14, %s286_s14  ;;  %p1904_p12 = scmp.lt.s32.totalorder %s1895_s23, %s1895_s23 }
  0x1c   : > { %p2317_p6 = pnand %p1756_p5, %p2751_p1 }
  0x1d   : > { %p1905_p13 = por %p1904_p12, %p1903_p11 }
  0x1e   : > { %s2778_s19 = scalar_select %p2317_p6, 1, 0 }
  0x1f   : > { %p2325_p7 = pneg %p2317_p6 }
  0x21   : > { %s2779_s22 = scalar_select %p2325_p7, 1, 0 }
  0x22   : > { %p1898_p9 = pnand %p1896_p8, %p2325_p7 }
  0x24   : > { %p1899_p10 = pneg %p1898_p9 }
  0x26   : > { %p1906_p0 = pnand %p1905_p13, %p1899_p10 }
  0x28   : > { %1909 = shalt.err (!%p1906_p0)
}
  0x29   : > { %s2744_s24 = smov 64   ;;  %s2746_s25 = smov 4  }
  0x2a   : > { %s2780_s4 = sld [smem:[#allocation33_spill]]  ;;  %s1921_s28 = scalar_lea.vmem %s2313_s18, 1024 }
  0x2b   : > { %p1922_p3 = scmp.ne.s32.totalorder %s2313_s18, %s1921_s28  ;;  %p1929_p9 = scmp.lt.s32.totalorder %s2313_s18, %s2313_s18 }
  0x2c   : > { %p1930_p10 = scmp.lt.s32.totalorder %s1921_s28, %s1921_s28 }
  0x2d   : > { %p1924_p5 = pnand %p1922_p3, %p2325_p7 }
  0x2e   : > { %p1931_p11 = por %p1930_p10, %p1929_p9 }
  0x2f   : > { %p1925_p8 = pneg %p1924_p5 }
  0x30   : > { %1759 = dma.hbm_to_vmem [thread:$0]  (!%p2317_p6), %s2780_s4, 1024, %s286_s14, [#allocation9], %s2744_s24, %s2744_s24, %s2746_s25  }
  0x31   : > { %p1932_p12 = pnand %p1931_p11, %p1925_p8 }
  0x33   : > { %1935 = shalt.err (!%p1932_p12)
}
  0x34   : > { %s2781_s5 = sld [smem:[#allocation34_spill]]  ;;  %s1947_s14 = scalar_lea.vmem %s2321_s21, 1024 }
  0x35   : > { %p1948_p13 = scmp.ne.s32.totalorder %s2321_s21, %s1947_s14  ;;  %p1955_p5 = scmp.lt.s32.totalorder %s2321_s21, %s2321_s21 }
  0x36   : > { %p1956_p8 = scmp.lt.s32.totalorder %s1947_s14, %s1947_s14 }
  0x37   : > { %p1950_p0 = pnand %p1948_p13, %p2325_p7 }
  0x38   : > { %p1957_p9 = por %p1956_p8, %p1955_p5 }
  0x39   : > { %p1951_p3 = pneg %p1950_p0 }
  0x3a   : > { %1762 = dma.hbm_to_vmem [thread:$0]  (!%p2317_p6), %s2781_s5, 1024, %s2313_s18, [#allocation12], %s2744_s24, %s2744_s24, %s2746_s25  }
  0x3b   : > { %p1958_p10 = pnand %p1957_p9, %p1951_p3 }
  0x3d   : > { %1961 = shalt.err (!%p1958_p10)
}
  0x3e   : > { %s2782_s7 = sld [smem:[#allocation35_spill]]  ;;  %s1459_s18 = sadd.s32 4294967294, %s2210_s12  }
  0x3f   : > { %s2371_s23 = sadd.s32 1, %s2210_s12   ;;  %s40_s27 = sadd.s32 1, %s2206_s11 }
  0x40   : > { %2783 = sst [smem:[#allocation28_spill]] %s2371_s23  ;;  %s37_s26 = ssub.s32 %s2210_s12, %s2371_s23 }
  0x41   : > { %p38_p11 = scmp.eq.s32.totalorder %s37_s26, 0  ;;  %p47_p12 = scmp.ne.s32.totalorder %s2206_s11, %s2202_s10 }
  0x42   : > { %p48_p13 = scmp.eq.s32.totalorder %s2210_s12, 0  ;;  %p53_p0 = scmp.ne.s32.totalorder %s2202_s10, %s2198_s30 }
  0x43   : > { %s2382_s28 = scalar_select %p38_p11, %s2206_s11, %s40_s27  }
  0x44   : > { %1768 = dma.hbm_to_vmem [thread:$0]  (!%p2317_p6), %s2782_s7, 1024, %s2321_s21, [#allocation15], %s2744_s24, %s2744_s24, %s2746_s25  }
  0x45   : > { %2784 = sst [smem:[#allocation29_spill]] %s2382_s28  ;;  %p49_p3 = por %p48_p13, %p47_p12 }
  0x46   : > { %p2386_p5 = por %p2751_p1, %p53_p0  ;;  %p2392_p8 = por %p260_p2, %p47_p12 }
  0x47   : > { %p266_p9 = scmp.eq.s32.totalorder %s1459_s18, 7  ;;  %p1794_p10 = scmp.lt.s32.totalorder %s2210_s12, 8 }
  0x48   : > { %s2785_s21 = scalar_select %p2386_p5, 1, 0 }
  0x49   : > { %s2786_s29 = scalar_select %p2392_p8, 1, 0 }
  0x4a   : > { %s2398_s13 = sand.u32 1, %s2206_s11   ;;  %p2400_p11 = por %p266_p9, %p53_p0 }
  0x4b   : > { %2787 = sst [smem:[#allocation30_spill]] %s2786_s29  ;;  %s2752_s17 = sand.u32 1, %s2210_s12  }
  0x4c   : > { %s2788_s14 = scalar_select %p2400_p11, 1, 0 }
  0x4d   : > { %p2405_p13 = pnand %p1794_p10, %p49_p3  ;;  %s2749_s26 = sshll.u32 %s2398_s13, 4 }
  0x4e   : > { %2789 = sst [smem:[#allocation31_spill]] %s2788_s14  ;;  %s2750_s27 = sshll.u32 %s2210_s12, 8 }
  0x4f   : > { %s2791_s1 = sld [smem:[#allocation32_spill]]  ;;  %s376_s4 = scalar_lea.vmem [#allocation5], %s2749_s26 }
  0x50   : > { %s383_s5 = sshll.u32 %s376_s4, 4  ;;  %s2424_s7 = scalar_lea.sflag [#allocation6], %s2752_s17  ;;  %s2420_s5 = int_to_ptr.vmem [resolvable:$true] %s383_s5 }
  0x51   : > { %p2430_p12 = pneg %p2405_p13 }
  0x55   : > { %s2416_s25 = scalar_lea.hbm %s2791_s1, %s2750_s27  ;;  %s1967_s4 = scalar_lea.hbm %s2791_s1, 2048 }
  0x56   : > { %s1962_s28 = scalar_lea.hbm %s2416_s25, 256  ;;  %p1968_p9 = scmp.lt.s32.totalorder %s2416_s25, %s2791_s1 }
  0x57   : > { %p1963_p2 = scmp.ne.s32.totalorder %s2416_s25, %s1962_s28  ;;  %p1969_p10 = scmp.lt.s32.totalorder %s1967_s4, %s1962_s28 }
  0x59   : > { %p1965_p0 = pnand %p2430_p12, %p1963_p2  ;;  %p1970_p1 = por %p1969_p10, %p1968_p9 }
  0x5b   : > { %p1966_p3 = pneg %p1965_p0 }
  0x5d   : > { %p1971_p11 = pnand %p1970_p1, %p1966_p3 }
  0x5f   : > { %1974 = shalt.err (!%p1971_p11)
}
  0x60   : > { %s1975_s17 = scalar_lea.vmem %s2420_s5, 256  ;;  %s2217_s23 = smov [#allocation5]  }
  0x61   : > { %p1976_p8 = scmp.ne.s32.totalorder %s2420_s5, %s1975_s17  ;;  %s1980_s24 = sshll.u32 %s2217_s23, 4  ;;  %s1981_s24 = int_to_ptr.vmem [resolvable:$false] %s1980_s24 }
  0x62   : > { %s1982_s18 = scalar_lea.vmem %s1981_s24, 512  ;;  %p1983_p5 = scmp.lt.s32.totalorder %s2420_s5, %s1981_s24 }
  0x63   : > { %p1978_p2 = pnand %p1976_p8, %p2430_p12  ;;  %p1984_p4 = scmp.lt.s32.totalorder %s1982_s18, %s1975_s17 }
  0x65   : > { %p1979_p0 = pneg %p1978_p2  ;;  %p1985_p6 = por %p1984_p4, %p1983_p5 }
  0x67   : > { %p1986_p7 = pnand %p1985_p6, %p1979_p0 }
  0x69   : > { %1989 = shalt.err (!%p1986_p7)
}
  0x6a   : > { %s2793_s28 = smov 4   ;;  %s2794_s26 = smov 64  }
  0x6b   : > { %1778 = dma.hbm_to_vmem [thread:$0]  (!%p2405_p13), %s2416_s25, 256, %s2420_s5, %s2424_s7, %s2794_s26, %s2794_s26, %s2793_s28  }
  0x6c   : > { %s2795_s23 = sshll.u32 %s2210_s12, 8  ;;  %s2796_s24 = sshll.u32 %s2398_s13, 4 }
  0x6d   : > { %s2461_s17 = scalar_lea.hbm %s2736_s2, %s2795_s23  ;;  %s397_s18 = scalar_lea.vmem [#allocation7], %s2796_s24 }
  0x6e   : > { %s404_s1 = sshll.u32 %s397_s18, 4  ;;  %s2218_s14 = smov [#allocation13]   ;;  %s2465_s1 = int_to_ptr.vmem [resolvable:$true] %s404_s1 }
  0x6f   : > { %s311_s30 = sshll.u32 %s2218_s14, 4  ;;  %s2219_s9 = smov [#allocation16]   ;;  %s312_s30 = int_to_ptr.vmem [resolvable:$true] %s311_s30 }
  0x70   : > { %s337_s29 = sshll.u32 %s2219_s9, 4  ;;  %s2001_s15 = scalar_lea.vmem %s312_s30, 1024  ;;  %s338_s29 = int_to_ptr.vmem [resolvable:$true] %s337_s29 }
  0x71   : > { %p2002_p1 = scmp.ne.s32.totalorder %s312_s30, %s2001_s15  ;;  %p2797_p4 = scmp.ne.s32.totalorder %s2779_s22, 0 }
  0x72   : > { %p2009_p5 = scmp.lt.s32.totalorder %s312_s30, %s312_s30  ;;  %p2010_p8 = scmp.lt.s32.totalorder %s2001_s15, %s2001_s15 }
  0x73   : > { %p2004_p6 = pnand %p2002_p1, %p2797_p4 }
  0x74   : > { %p2011_p11 = por %p2010_p8, %p2009_p5 }
  0x75   : > { %p2005_p7 = pneg %p2004_p6 }
  0x77   : > { %p2012_p3 = pnand %p2011_p11, %p2005_p7 }
  0x79   : > { %2015 = shalt.err (!%p2012_p3)
}
  0x7a   : > { %p2798_p9 = scmp.ne.s32.totalorder %s2778_s19, 0  ;;  %s2027_s9 = scalar_lea.vmem %s338_s29, 256 }
  0x7b   : > { %p2028_p10 = scmp.ne.s32.totalorder %s338_s29, %s2027_s9  ;;  %p2035_p1 = scmp.lt.s32.totalorder %s338_s29, %s338_s29 }
  0x7c   : > { %1765 = dma.hbm_to_vmem [thread:$0]  (!%p2798_p9), %s2740_s6, 1024, %s312_s30, [#allocation12], %s2794_s26, %s2794_s26, %s2793_s28  }
  0x7d   : > { %p2030_p2 = pnand %p2028_p10, %p2797_p4  ;;  %p2036_p6 = scmp.lt.s32.totalorder %s2027_s9, %s2027_s9 }
  0x7f   : > { %p2031_p0 = pneg %p2030_p2  ;;  %p2037_p5 = por %p2036_p6, %p2035_p1 }
  0x81   : > { %p2038_p7 = pnand %p2037_p5, %p2031_p0 }
  0x83   : > { %2041 = shalt.err (!%p2038_p7)
}
  0x84   : > { %s2220_s15 = smov 128   ;;  %s2221_s14 = smov 8  }
  0x85   : > { %1771 = dma.hbm_to_vmem [thread:$0]  (!%p2798_p9), %s2742_s8, 256, %s338_s29, [#allocation15], %s2220_s15, %s2220_s15, %s2221_s14  }
  0x86   : > { %s1467_s22 = sshll.u32 %s2398_s13, 3  ;;  %s1538_s27 = sshll.u32 %s2210_s12, 7 }
  0x87   : > { %s2491_s18 = scalar_lea.hbm %s2734_s0, %s1538_s27  ;;  %s355_s5 = scalar_lea.vmem [#allocation2], %s1467_s22 }
  0x88   : > { %s362_s25 = sshll.u32 %s355_s5, 4  ;;  %s352_s19 = scalar_lea.sflag [#allocation3], %s2398_s13  ;;  %s2495_s25 = int_to_ptr.vmem [resolvable:$true] %s362_s25 }
  0x89   : > { %s2042_s9 = scalar_lea.hbm %s2491_s18, 128  ;;  %s2047_s14 = scalar_lea.hbm %s2734_s0, 1024 }
  0x8a   : > { %p2043_p4 = scmp.ne.s32.totalorder %s2491_s18, %s2042_s9  ;;  %p2048_p3 = scmp.lt.s32.totalorder %s2491_s18, %s2734_s0 }
  0x8b   : > { %p2049_p9 = scmp.lt.s32.totalorder %s2047_s14, %s2042_s9 }
  0x8c   : > { %p2045_p8 = pnand %p2043_p4, %p2430_p12 }
  0x8d   : > { %p2050_p10 = por %p2049_p9, %p2048_p3 }
  0x8e   : > { %p2046_p11 = pneg %p2045_p8 }
  0x90   : > { %p2051_p2 = pnand %p2050_p10, %p2046_p11 }
  0x92   : > { %2054 = shalt.err (!%p2051_p2)
}
  0x93   : > { %s2055_s4 = scalar_lea.vmem %s2495_s25, 128  ;;  %s2222_s24 = smov [#allocation2]  }
  0x94   : > { %p2056_p0 = scmp.ne.s32.totalorder %s2495_s25, %s2055_s4  ;;  %s2060_s5 = sshll.u32 %s2222_s24, 4  ;;  %s2061_s5 = int_to_ptr.vmem [resolvable:$false] %s2060_s5 }
  0x95   : > { %s2062_s29 = scalar_lea.vmem %s2061_s5, 256  ;;  %p2063_p5 = scmp.lt.s32.totalorder %s2495_s25, %s2061_s5 }
  0x96   : > { %p2058_p1 = pnand %p2056_p0, %p2430_p12  ;;  %p2064_p7 = scmp.lt.s32.totalorder %s2062_s29, %s2055_s4 }
  0x98   : > { %p2059_p6 = pneg %p2058_p1  ;;  %p2065_p4 = por %p2064_p7, %p2063_p5 }
  0x9a   : > { %p2066_p8 = pnand %p2065_p4, %p2059_p6 }
  0x9c   : > { %2069 = shalt.err (!%p2066_p8)
}
  0x9d   : > { %1775 = dma.hbm_to_vmem [thread:$0]  (!%p2405_p13), %s2491_s18, 128, %s2495_s25, %s352_s19, %s2794_s26, %s2794_s26, %s2793_s28  }
  0x9e   : > { %s2526_s14 = scalar_lea.hbm %s2737_s3, %s1538_s27  ;;  %s418_s30 = scalar_lea.vmem [#allocation8], %s1467_s22 }
  0x9f   : > { %s425_s23 = sshll.u32 %s418_s30, 4  ;;  %s2070_s4 = scalar_lea.hbm %s2461_s17, 256  ;;  %s2530_s23 = int_to_ptr.vmem [resolvable:$true] %s425_s23 }
  0xa0   : > { %p2071_p11 = scmp.ne.s32.totalorder %s2461_s17, %s2070_s4  ;;  %s2075_s18 = scalar_lea.hbm %s2736_s2, 2048 }
  0xa1   : > { %p2076_p10 = scmp.lt.s32.totalorder %s2461_s17, %s2736_s2  ;;  %p2077_p2 = scmp.lt.s32.totalorder %s2075_s18, %s2070_s4 }
  0xa2   : > { %p2073_p3 = pnand %p2071_p11, %p2430_p12 }
  0xa3   : > { %p2078_p0 = por %p2077_p2, %p2076_p10 }
  0xa4   : > { %p2074_p9 = pneg %p2073_p3 }
  0xa6   : > { %p2079_p1 = pnand %p2078_p0, %p2074_p9 }
  0xa8   : > { %2082 = shalt.err (!%p2079_p1)
}
  0xa9   : > { %s2083_s13 = scalar_lea.vmem %s2465_s1, 256  ;;  %s2223_s22 = smov [#allocation7]  }
  0xaa   : > { %p2084_p6 = scmp.ne.s32.totalorder %s2465_s1, %s2083_s13  ;;  %s2088_s27 = sshll.u32 %s2223_s22, 4  ;;  %s2089_s27 = int_to_ptr.vmem [resolvable:$false] %s2088_s27 }
  0xab   : > { %s2090_s29 = scalar_lea.vmem %s2089_s27, 512  ;;  %p2091_p4 = scmp.lt.s32.totalorder %s2465_s1, %s2089_s27 }
  0xac   : > { %p2086_p5 = pnand %p2084_p6, %p2430_p12  ;;  %p2092_p8 = scmp.lt.s32.totalorder %s2090_s29, %s2083_s13 }
  0xae   : > { %p2087_p7 = pneg %p2086_p5  ;;  %p2093_p11 = por %p2092_p8, %p2091_p4 }
  0xb0   : > { %p2094_p3 = pnand %p2093_p11, %p2087_p7 }
  0xb2   : > { %2097 = shalt.err (!%p2094_p3)
}
  0xb3   : > { %1781 = dma.hbm_to_vmem [thread:$0]  (!%p2405_p13), %s2461_s17, 256, %s2465_s1, %s2424_s7, %s2794_s26, %s2794_s26, %s2793_s28  }
  0xb4   : > { %s2799_s9 = sand.u32 1, %s2210_s12   ;;  %s2098_s30 = scalar_lea.hbm %s2526_s14, 128 }
  0xb5   : > { %s415_s15 = scalar_lea.sflag [#allocation9], %s2799_s9  ;;  %p2099_p9 = scmp.ne.s32.totalorder %s2526_s14, %s2098_s30 }
  0xb6   : > { %s2103_s5 = scalar_lea.hbm %s2737_s3, 1024  ;;  %p2104_p0 = scmp.lt.s32.totalorder %s2526_s14, %s2737_s3 }
  0xb7   : > { %p2101_p10 = pnand %p2099_p9, %p2430_p12  ;;  %p2105_p1 = scmp.lt.s32.totalorder %s2103_s5, %s2098_s30 }
  0xb9   : > { %p2102_p2 = pneg %p2101_p10  ;;  %p2106_p6 = por %p2105_p1, %p2104_p0 }
  0xbb   : > { %p2107_p5 = pnand %p2106_p6, %p2102_p2 }
  0xbd   : > { %2110 = shalt.err (!%p2107_p5)
}
  0xbe   : > { %s2111_s1 = scalar_lea.vmem %s2530_s23, 128  ;;  %s2224_s7 = smov [#allocation8]  }
  0xbf   : > { %p2112_p7 = scmp.ne.s32.totalorder %s2530_s23, %s2111_s1  ;;  %s2116_s17 = sshll.u32 %s2224_s7, 4  ;;  %s2117_s17 = int_to_ptr.vmem [resolvable:$false] %s2116_s17 }
  0xc0   : > { %s2118_s19 = scalar_lea.vmem %s2117_s17, 256  ;;  %p2119_p11 = scmp.lt.s32.totalorder %s2530_s23, %s2117_s17 }
  0xc1   : > { %p2114_p4 = pnand %p2112_p7, %p2430_p12  ;;  %p2120_p3 = scmp.lt.s32.totalorder %s2118_s19, %s2111_s1 }
  0xc3   : > { %p2115_p8 = pneg %p2114_p4  ;;  %p2121_p9 = por %p2120_p3, %p2119_p11 }
  0xc5   : > { %p2122_p10 = pnand %p2121_p9, %p2115_p8 }
  0xc7   : > { %2125 = shalt.err (!%p2122_p10)
}
  0xc8   : > { %1784 = dma.hbm_to_vmem [thread:$0]  (!%p2405_p13), %s2526_s14, 128, %s2530_s23, %s415_s15, %s2794_s26, %s2794_s26, %s2793_s28  }
  0xc9   : > { %p2800_p12 = scmp.ne.s32.totalorder %s2777_s16, 0 }
  0xca   : > { %s2584_s11 = sand.u32 (!%p2800_p12), 1, %s2202_s10   ;;  %p2801_p2 = scmp.ne.s32.totalorder (!%p2800_p12), %s2785_s21, 0 }
  0xcb   : > { %437 = sbr.rel (%p2800_p12) target bundleno = 1714 (0x6b2), region = 56  ;;  %s1480_s13 = sshll.u32 (!%p2800_p12), %s2584_s11, 3 }
  0xcc   : > { %s440_s22 = scalar_lea.sflag (!%p2800_p12), [#allocation3], %s2584_s11  ;;  %s2588_s27 = scalar_lea.vmem (!%p2800_p12), [#allocation2], %s1480_s13 }
  0xd0   : > { %2169 = dma.done.wait (%p2801_p2), %s440_s22, 128  }
  0xd1   : > { %2171 = vsyncadd (%p2801_p2), %s440_s22, 4294967168  ;;  %s2802_s20 = sld [smem:[#allocation27_spill]]  ;;  %s2596_s28 = sshll.u32 %s2584_s11, 4 }
  0xd2   : > { %s452_s14 = scalar_lea.vmem [#allocation5], %s2596_s28 }
  0xd7   : > { %s448_s16 = sand.u32 1, %s2802_s20  }
  0xd8   : > { %s449_s26 = scalar_lea.sflag [#allocation6], %s448_s16 }
  0xd9   : > { %2173 = dma.done.wait (%p2801_p2), %s449_s26, 512  }
  0xda   : > { %2175 = vsyncadd (%p2801_p2), %s449_s26, 4294966784  ;;  %s461_s23 = scalar_lea.vmem [#allocation7], %s2596_s28  ;;  %s467_s29 = scalar_lea.sflag [#allocation9], %s448_s16 }
  0xdb   : > { %s2604_s9 = scalar_lea.vmem [#allocation8], %s1480_s13 }
  0xdc   : > { %2177 = dma.done.wait (%p2801_p2), %s467_s29, 128  }
  0xdd   : > { %2179 = vsyncadd (%p2801_p2), %s467_s29, 4294967168  ;;  %p2803_p13 = scmp.eq.s32.totalorder %s2802_s20, 0 }
  0xdf   : > { %2181 = dma.done.wait (%p2803_p13), [#allocation9], 1024   ;;  %p2804_p0 = pmov %p2803_p13 }
  0xe1   : > { %2183 = vsyncadd (%p2804_p0), [#allocation9], 4294966272  ;;  %p2805_p1 = pmov %p2804_p0 }
  0xe2   : > { %p2806_p6 = pmov %p2804_p0 }
  0xe3   : > { %2185 = dma.done.wait (%p2805_p1), [#allocation12], 2048  }
  0xe4   : > { %2187 = vsyncadd (%p2806_p6), [#allocation12], 4294965248  ;;  %p2807_p5 = pmov %p2804_p0 }
  0xe5   : > { %p2808_p7 = pmov %p2804_p0 }
  0xe6   : > { %2189 = dma.done.wait (%p2807_p5), [#allocation15], 1280  }
  0xe7   : > { %2191 = vsyncadd (%p2808_p7), [#allocation15], 4294966016  ;;  %v1846_v0 = vld [vmem:[#allocation10 + $0x38] sm:$0xff]   ;;  %v1847_v1 = vld [vmem:[#allocation10 + $0x30] sm:$0xff]   ;;  %vm706_vm0 = vcmask 261120   ;;  %v2225_v56 = vmov 0.0  }
  0xe8   : > { %1602 = vmatprep.subr.bf16.mxu0 %v1846_v0  ;;  %v1848_v2 = vld [vmem:[#allocation10 + $0x28] sm:$0xff]   ;;  %v1849_v3 = vld [vmem:[#allocation10 + $0x20] sm:$0xff]   ;;  %v1850_v5 = vld [vmem:[#allocation10 + $0x18] sm:$0xff]   ;;  %vm2226_vm1 = vmmov 0   ;;  %s539_s21 = scalar_lea.vmem [#allocation17], %s2596_s28  ;;  %s2809_s30 = sld [smem:[#allocation30_spill]] }
  0xe9   : > { %1603 = vmatpush3.bf16.msra.mxu0 %v1846_v0  ;;  %v1854_v4 = vld [vmem:[%s452_s14] sm:$0xff]   ;;  %v1852_v7 = vld [vmem:[#allocation10 + $0x8] sm:$0xff]   ;;  %v1858_v11 = vld [vmem:[#allocation11 + $0x38] sm:$0xff]   ;;  %s1273_s15 = sshll.u32 %s539_s21, 4  ;;  %s1542_s4 = sshll.u32 %s2802_s20, 8  ;;  %s2687_s15 = int_to_ptr.vmem [resolvable:$true] %s1273_s15 }
  0xea   : > { %1604 = vmatprep.subr.bf16.mxu0 %v1847_v1  ;;  %1618 = vmatprep.mubr.bf16.mxu0 %v1854_v4  ;;  %v1851_v6 = vld [vmem:[#allocation10 + $0x10] sm:$0xff]   ;;  %v1853_v8 = vld [vmem:[#allocation10] sm:$0xff]   ;;  %v1855_v9 = vld [vmem:[%s452_s14 + $0x8] sm:$0xff]   ;;  %s2810_s18 = sld [smem:[#allocation36_spill]]  ;;  %s1260_s1 = scalar_lea.sflag [#allocation4], %s2584_s11 }
  0xeb   : > { %v2628_v10 = vld [vmem:[%s461_s23] sm:$0xff]   ;;  %v1860_v13 = vld [vmem:[#allocation11 + $0x28] sm:$0xff]   ;;  %v1862_v15 = vld [vmem:[#allocation11 + $0x18] sm:$0xff]   ;;  %s2126_s7 = scalar_lea.vmem %s2687_s15, 256  ;;  %s2227_s17 = smov [#allocation17]  }
  0xec   : > { %1626 = vmatprep.mubr.msk.bf16.mxu1 %vm706_vm0, %v2628_v10  ;;  %v1859_v12 = vld [vmem:[#allocation11 + $0x30] sm:$0xff]   ;;  %v1861_v14 = vld [vmem:[#allocation11 + $0x20] sm:$0xff]   ;;  %v1857_v27 = vld [vmem:[%s461_s23 + $0x8] sm:$0xff]   ;;  %p2127_p4 = scmp.ne.s32.totalorder %s2687_s15, %s2126_s7  ;;  %s2130_s19 = sshll.u32 %s2227_s17, 4  ;;  %s2131_s19 = int_to_ptr.vmem [resolvable:$false] %s2130_s19 }
  0xed   : > { %1605 = vmatpush3.bf16.msra.mxu0 %v1847_v1  ;;  %v1863_v16 = vld [vmem:[#allocation11 + $0x10] sm:$0xff]   ;;  %v1864_v28 = vld [vmem:[#allocation11 + $0x8] sm:$0xff]   ;;  %v1865_v29 = vld [vmem:[#allocation11] sm:$0xff]   ;;  %s2132_s13 = scalar_lea.vmem %s2131_s19, 512  ;;  %p2133_p9 = scmp.lt.s32.totalorder %s2687_s15, %s2131_s19 }
  0xee   : > { %1606 = vmatprep.subr.bf16.mxu0 %v1848_v2  ;;  %v1867_v57 = vld [vmem:[#allocation13 + $0x38] sm:$0xff]   ;;  %v1868_v58 = vld [vmem:[#allocation13 + $0x30] sm:$0xff]   ;;  %v1870_v59 = vld [vmem:[#allocation13 + $0x28] sm:$0xff]   ;;  %p2811_p8 = scmp.ne.s32.totalorder %s2809_s30, 0  ;;  %p2134_p10 = scmp.lt.s32.totalorder %s2132_s13, %s2126_s7 }
  0xef   : > { %v1872_v60 = vld [vmem:[#allocation13 + $0x20] sm:$0xff]   ;;  %v1874_v61 = vld [vmem:[#allocation13 + $0x18] sm:$0xff]   ;;  %v1876_v62 = vld [vmem:[#allocation13 + $0x10] sm:$0xff]  }
  0xf0   : > { %v1878_v63 = vld [vmem:[#allocation13 + $0x8] sm:$0xff]   ;;  %v1880_v0 = vld [vmem:[#allocation13] sm:$0xff]   ;;  %s2692_s25 = scalar_lea.hbm %s2810_s18, %s1542_s4  ;;  %p2128_p11 = pnand %p2127_p4, %p2811_p8 }
  0xf1   : > { %1607 = vmatpush3.bf16.msra.mxu0 %v1848_v2  ;;  %p2135_p12 = por %p2134_p10, %p2133_p9 }
  0xf2   : > { %1608 = vmatprep.subr.bf16.mxu0 %v1849_v3  ;;  %p2129_p3 = pneg %p2128_p11 }
  0xf4   : > { %p2136_p2 = pnand %p2135_p12, %p2129_p3 }
  0xf5   : > { %1609 = vmatpush3.bf16.msra.mxu0 %v1849_v3 }
  0xf6   : > { %1610 = vmatprep.subr.bf16.mxu0 %v1850_v5 }
  0xf9   : > { %1611 = vmatpush3.bf16.msra.mxu0 %v1850_v5 }
  0xfa   : > { %1612 = vmatprep.subr.bf16.mxu0 %v1851_v6 }
  0xfd   : > { %1613 = vmatpush3.bf16.msra.mxu0 %v1851_v6 }
  0xfe   : > { %1614 = vmatprep.subr.bf16.mxu0 %v1852_v7 }
 0x101   : > { %1615 = vmatpush3.bf16.msra.mxu0 %v1852_v7 }
 0x102   : > { %1616 = vmatprep.subr.bf16.mxu0 %v1853_v8 }
 0x105   : > { %1617 = vmatpush3.bf16.msra.mxu0 %v1853_v8 }
 0x106   : > { %1658 = vmatprep.subr.bf16.mxu0 %v1858_v11 }
 0x108   : > { %1619 = vmatmul.mubr.bf16.vlgmr.msra.gmra.mxu0 %v1855_v9 }
 0x109   : > { %1659 = vmatpush3.bf16.msra.mxu0 %v1858_v11 }
 0x10a   : > { %1660 = vmatprep.subr.bf16.mxu0 %v1859_v12 }
 0x10d   : > { %1661 = vmatpush3.bf16.msra.mxu0 %v1859_v12 }
 0x10e   : > { %1662 = vmatprep.subr.bf16.mxu0 %v1860_v13 }
 0x111   : > { %1663 = vmatpush3.bf16.msra.mxu0 %v1860_v13 }
 0x112   : > { %1664 = vmatprep.subr.bf16.mxu0 %v1861_v14 }
 0x115   : > { %1665 = vmatpush3.bf16.msra.mxu0 %v1861_v14 }
 0x116   : > { %1666 = vmatprep.subr.bf16.mxu0 %v1862_v15 }
 0x119   : > { %1667 = vmatpush3.bf16.msra.mxu0 %v1862_v15 }
 0x11a   : > { %1668 = vmatprep.subr.bf16.mxu0 %v1863_v16 }
 0x11d   : > { %1669 = vmatpush3.bf16.msra.mxu0 %v1863_v16 }
 0x11e   : > { %1670 = vmatprep.subr.bf16.mxu0 %v1864_v28 }
 0x121   : > { %1671 = vmatpush3.bf16.msra.mxu0 %v1864_v28 }
 0x122   : > { %1672 = vmatprep.subr.bf16.mxu0 %v1865_v29 }
 0x125   : > { %1673 = vmatpush3.bf16.msra.mxu0 %v1865_v29 }
 0x126   : > { %1706 = vmatprep.subr.bf16.mxu0 %v2225_v56 }
 0x1c8   : > { %v2632_v17 = vpop.f32.mrf.mxu0 }
 0x1c9   : > { %v672_v20 = vmax.f32 %v2632_v17, 0.0 }
 0x1ca   : > { %v2634_v18 = vpop.f32.mrf.mxu0 }
 0x1cb   : > { %v670_v23 = vmax.f32 %v2634_v18, 0.0 }
 0x1cc   : > { %v2636_v19 = vpop.f32.mrf.mxu0 }
 0x1cd   : > { %v673_v21 = vmax.f32 %v2636_v19, 0.0 }
 0x1ce   : > { %v2640_v22 = vpop.f32.mrf.mxu0 }
 0x1cf   : > { %v671_v24 = vmax.f32 %v2640_v22, 0.0  ;;  %v695_v25 = vpack.c.bf16 %v673_v21, %v672_v20  ;;  %v1877_v20 = vld [vmem:[#allocation14 + $0x18] sm:$0xff]   ;;  %v1879_v21 = vld [vmem:[#allocation14 + $0x10] sm:$0xff]  }
 0x1d1   : > { %1622 = vmatprep.subr.bf16.mxu1 %v695_v25  ;;  %v694_v26 = vpack.c.bf16 %v671_v24, %v670_v23  ;;  %v1882_v23 = vld [vmem:[%s2588_s27] sm:$0xff]  }
 0x1d2   : > { %1623 = vmatpush3.bf16.msra.mxu1 %v695_v25  ;;  %v1883_v24 = vld [vmem:[#allocation14] sm:$0xff]  }
 0x1d3   : > { %1624 = vmatprep.subr.bf16.mxu1 %v694_v26 }
 0x1d6   : > { %1625 = vmatpush3.bf16.msra.mxu1 %v694_v26 }
 0x1d7   : > { %1630 = vmatprep.subr.bf16.mxu1 %v1858_v11 }
 0x1d9   : > { %1627 = vmatmul.mubr.msk.bf16.vlgmr.msra.gmra.mxu1 %vm706_vm0, %v1857_v27 }
 0x1da   : > { %1631 = vmatpush3.bf16.msra.mxu1 %v1858_v11 }
 0x1db   : > { %1632 = vmatprep.subr.bf16.mxu1 %v1859_v12 }
 0x1de   : > { %1633 = vmatpush3.bf16.msra.mxu1 %v1859_v12 }
 0x1df   : > { %1634 = vmatprep.subr.bf16.mxu1 %v1860_v13 }
 0x1e2   : > { %1635 = vmatpush3.bf16.msra.mxu1 %v1860_v13 }
 0x1e3   : > { %1636 = vmatprep.subr.bf16.mxu1 %v1861_v14 }
 0x1e6   : > { %1637 = vmatpush3.bf16.msra.mxu1 %v1861_v14 }
 0x1e7   : > { %1638 = vmatprep.subr.bf16.mxu1 %v1862_v15 }
 0x1ea   : > { %1639 = vmatpush3.bf16.msra.mxu1 %v1862_v15  ;;  %v1866_v15 = vld [vmem:[%s2604_s9] sm:$0xff]  }
 0x1eb   : > { %1640 = vmatprep.subr.bf16.mxu1 %v1863_v16 }
 0x1ee   : > { %1641 = vmatpush3.bf16.msra.mxu1 %v1863_v16  ;;  %v1869_v16 = vld [vmem:[#allocation14 + $0x38] sm:$0xff]  }
 0x1ef   : > { %1642 = vmatprep.subr.bf16.mxu1 %v1864_v28 }
 0x1f2   : > { %1643 = vmatpush3.bf16.msra.mxu1 %v1864_v28 }
 0x1f3   : > { %1644 = vmatprep.subr.bf16.mxu1 %v1865_v29 }
 0x1f6   : > { %1645 = vmatpush3.bf16.msra.mxu1 %v1865_v29 }
 0x299   : > { %v1628_v30 = vpop.f32.mrf.mxu1 }
 0x29b   : > { %v747_v31 = vpop.f32.mrf.mxu1 }
 0x29d   : > { %v1629_v32 = vpop.f32.mrf.mxu1 }
 0x29e   : > { %v763_v35 = vpack.c.bf16 %v1629_v32, %v1628_v30 }
 0x29f   : > { %v750_v33 = vpop.f32.mrf.mxu1 }
 0x2a0   : > { %v762_v34 = vpack.c.bf16 %v750_v33, %v747_v31 }
 0x2a2   : > { %1646 = vmatprep.mubr.bf16.mxu1 %v762_v34 }
 0x2a3   : > { %1647 = vmatmul.mubr.bf16.vlgmr.msra.gmra.mxu1 %v763_v35  ;;  %v1251_v35 = vld [vmem:[#allocation16] sm:$0xff] }
 0x2a4   : > { %1654 = vmatprep.mubr.msk.bf16.mxu1 %vm706_vm0, %v2628_v10 }
 0x363   : > { %v1648_v36 = vpop.f32.mrf.mxu1 }
 0x364   : > { %v863_v38 = vadd.f32 %v1648_v36, %v2632_v17 }
 0x365   : > { %v846_v37 = vpop.f32.mrf.mxu1 }
 0x366   : > { %v861_v40 = vadd.f32 %v846_v37, %v2634_v18  ;;  %v867_v43 = vmax.f32 %v863_v38, 0.0 }
 0x367   : > { %v1649_v39 = vpop.f32.mrf.mxu1 }
 0x368   : > { %v864_v41 = vadd.f32 %v1649_v39, %v2636_v19  ;;  %v865_v46 = vmax.f32 %v861_v40, 0.0  ;;  %v1252_v40 = vld [vmem:[#allocation16 + $0x8] sm:$0xff] }
 0x369   : > { %v849_v42 = vpop.f32.mrf.mxu1 }
 0x36a   : > { %v868_v44 = vmax.f32 %v864_v41, 0.0  ;;  %v862_v45 = vadd.f32 %v849_v42, %v2640_v22 }
 0x36c   : > { %v870_v47 = vpack.c.bf16 %v868_v44, %v867_v43  ;;  %v866_v48 = vmax.f32 %v862_v45, 0.0 }
 0x36e   : > { %v869_v49 = vpack.c.bf16 %v866_v48, %v865_v46  ;;  %1650 = vmatprep.subr.bf16.mxu1 %v870_v47 }
 0x36f   : > { %1651 = vmatpush3.bf16.msra.mxu1 %v870_v47 }
 0x370   : > { %1652 = vmatprep.subr.bf16.mxu1 %v869_v49 }
 0x373   : > { %1653 = vmatpush3.bf16.msra.mxu1 %v869_v49 }
 0x374   : > { %1678 = vmatprep.subr.bf16.mxu1 %v2225_v56 }
 0x376   : > { %1655 = vmatmul.mubr.msk.bf16.vlgmr.msra.gmra.mxu1 %vm706_vm0, %v1857_v27 }
 0x377   : > { %1682 = vmatprep.mubr.msk.bf16.mxu1 %vm2226_vm1, %v2225_v56 }
 0x436   : > { %v1656_v50 = vpop.f32.mrf.mxu1 }
 0x438   : > { %v905_v51 = vpop.f32.mrf.mxu1 }
 0x43a   : > { %v1657_v52 = vpop.f32.mrf.mxu1 }
 0x43b   : > { %v921_v55 = vpack.c.bf16 %v1657_v52, %v1656_v50 }
 0x43c   : > { %v908_v53 = vpop.f32.mrf.mxu1 }
 0x43d   : > { %v920_v54 = vpack.c.bf16 %v908_v53, %v905_v51 }
 0x43f   : > { %1674 = vmatprep.mubr.bf16.mxu0 %v920_v54 }
 0x440   : > { %1675 = vmatmul.mubr.bf16.vlgmr.msra.gmra.mxu0 %v921_v55 }
 0x441   : > { %1722 = vmatprep.mubr.msk.bf16.mxu0 %vm2226_vm1, %v2225_v56  ;;  %1707 = vmatpush3.bf16.msra.mxu0 %v1867_v57 }
 0x442   : > { %1708 = vmatprep.subr.bf16.mxu0 %v2225_v56 }
 0x445   : > { %1709 = vmatpush3.bf16.msra.mxu0 %v1868_v58 }
 0x446   : > { %1710 = vmatprep.subr.bf16.mxu0 %v2225_v56 }
 0x449   : > { %1711 = vmatpush3.bf16.msra.mxu0 %v1870_v59 }
 0x44a   : > { %1712 = vmatprep.subr.bf16.mxu0 %v2225_v56 }
 0x44d   : > { %1713 = vmatpush3.bf16.msra.mxu0 %v1872_v60 }
 0x44e   : > { %1714 = vmatprep.subr.bf16.mxu0 %v2225_v56 }
 0x451   : > { %1715 = vmatpush3.bf16.msra.mxu0 %v1874_v61 }
 0x452   : > { %1716 = vmatprep.subr.bf16.mxu0 %v2225_v56 }
 0x455   : > { %1717 = vmatpush3.bf16.msra.mxu0 %v1876_v62 }
 0x456   : > { %1718 = vmatprep.subr.bf16.mxu0 %v2225_v56 }
 0x459   : > { %1719 = vmatpush3.bf16.msra.mxu0 %v1878_v63 }
 0x45a   : > { %1720 = vmatprep.subr.bf16.mxu0 %v2225_v56 }
 0x45d   : > { %1721 = vmatpush3.bf16.msra.mxu0 %v1880_v0 }
 0x460   : > { %1723 = vmatmul.mubr.bf16.vlgmr.msra.gmra.mxu0 %v1882_v23 }
 0x500   : > { %v1676_v1 = vpop.f32.mrf.mxu0 }
 0x501   : > { %v973_v3 = vadd.f32 %v1676_v1, %v2632_v17  ;;  %v1871_v17 = vld [vmem:[#allocation14 + $0x30] sm:$0xff]  }
 0x502   : > { %v956_v2 = vpop.f32.mrf.mxu0 }
 0x503   : > { %v977_v7 = vmax.f32 %v973_v3, 0.0  ;;  %v971_v8 = vadd.f32 %v956_v2, %v2634_v18  ;;  %v1873_v18 = vld [vmem:[#allocation14 + $0x28] sm:$0xff]  }
 0x504   : > { %v1677_v4 = vpop.f32.mrf.mxu0 }
 0x505   : > { %v974_v5 = vadd.f32 %v1677_v4, %v2636_v19  ;;  %v975_v13 = vmax.f32 %v971_v8, 0.0  ;;  %v1875_v19 = vld [vmem:[#allocation14 + $0x20] sm:$0xff]  }
 0x506   : > { %v959_v6 = vpop.f32.mrf.mxu0 }
 0x507   : > { %v978_v9 = vmax.f32 %v974_v5, 0.0  ;;  %v972_v10 = vadd.f32 %v959_v6, %v2640_v22  ;;  %v1881_v22 = vld [vmem:[#allocation14 + $0x8] sm:$0xff]  }
 0x509   : > { %v982_v11 = vpack.c.bf16 %v978_v9, %v977_v7  ;;  %v976_v12 = vmax.f32 %v972_v10, 0.0 }
 0x50b   : > { %1679 = vmatpush3.bf16.msra.mxu1 %v982_v11  ;;  %v981_v14 = vpack.c.bf16 %v976_v12, %v975_v13 }
 0x50c   : > { %1680 = vmatprep.subr.bf16.mxu1 %v2225_v56 }
 0x50f   : > { %1681 = vmatpush3.bf16.msra.mxu1 %v981_v14 }
 0x510   : > { %1686 = vmatprep.subr.bf16.mxu1 %v2225_v56 }
 0x512   : > { %1683 = vmatmul.mubr.msk.bf16.vlgmr.msra.gmra.mxu1 %vm706_vm0, %v1866_v15 }
 0x513   : > { %1687 = vmatpush3.bf16.msra.mxu1 %v1869_v16  ;;  %1702 = vmatprep.mubr.msk.bf16.mxu1 %vm2226_vm1, %v2225_v56 }
 0x514   : > { %1688 = vmatprep.subr.bf16.mxu1 %v2225_v56 }
 0x517   : > { %1689 = vmatpush3.bf16.msra.mxu1 %v1871_v17 }
 0x518   : > { %1690 = vmatprep.subr.bf16.mxu1 %v2225_v56 }
 0x51b   : > { %1691 = vmatpush3.bf16.msra.mxu1 %v1873_v18 }
 0x51c   : > { %1692 = vmatprep.subr.bf16.mxu1 %v2225_v56 }
 0x51f   : > { %1693 = vmatpush3.bf16.msra.mxu1 %v1875_v19 }
 0x520   : > { %1694 = vmatprep.subr.bf16.mxu1 %v2225_v56  ;;  %v1244_v30 = vpop.f32.mrf.mxu0 }
 0x522   : > { %v1724_v31 = vpop.f32.mrf.mxu0 }
 0x523   : > { %1695 = vmatpush3.bf16.msra.mxu1 %v1877_v20 }
 0x524   : > { %1696 = vmatprep.subr.bf16.mxu1 %v2225_v56  ;;  %v1247_v32 = vpop.f32.mrf.mxu0 }
 0x526   : > { %v1725_v33 = vpop.f32.mrf.mxu0 }
 0x527   : > { %1697 = vmatpush3.bf16.msra.mxu1 %v1879_v21 }
 0x528   : > { %1698 = vmatprep.subr.bf16.mxu1 %v2225_v56 }
 0x52b   : > { %1699 = vmatpush3.bf16.msra.mxu1 %v1881_v22 }
 0x52c   : > { %1700 = vmatprep.subr.bf16.mxu1 %v2225_v56 }
 0x52f   : > { %1701 = vmatpush3.bf16.msra.mxu1 %v1883_v24 }
 0x5d2   : > { %v1025_v25 = vpop.f32.mrf.mxu1 }
 0x5d4   : > { %v1684_v26 = vpop.f32.mrf.mxu1 }
 0x5d6   : > { %v1028_v27 = vpop.f32.mrf.mxu1 }
 0x5d7   : > { %v1050_v28 = vpack.c.bf16 %v1028_v27, %v1025_v25 }
 0x5d8   : > { %v1685_v29 = vpop.f32.mrf.mxu1 }
 0x5d9   : > { %1703 = vmatmul.mubr.bf16.vlgmr.msra.gmra.mxu1 %v1050_v28 }
 0x699   : > { %v1149_v34 = vpop.f32.mrf.mxu1 }
 0x69a   : > { %v1245_v36 = vadd.f32 %v1244_v30, %v1149_v34 }
 0x69b   : > { %v1704_v37 = vpop.f32.mrf.mxu1 }
 0x69c   : > { %v1253_v38 = vadd.f32 %v1251_v35, %v1245_v36 }
 0x69d   : > { %v1152_v39 = vpop.f32.mrf.mxu1 }
 0x69e   : > { %v1255_v41 = vmax.f32 %v1253_v38, 0.0  ;;  %v1248_v42 = vadd.f32 %v1247_v32, %v1152_v39 }
 0x69f   : > { %v1705_v43 = vpop.f32.mrf.mxu1 }
 0x6a0   : > { %1257 = vst [vmem:[%s539_s21] sm:$0xff] %v1255_v41  ;;  %v1254_v44 = vadd.f32 %v1252_v40, %v1248_v42 }
 0x6a2   : > { %v1256_v45 = vmax.f32 %v1254_v44, 0.0 }
 0x6a4   : > { %1258 = vst [vmem:[%s539_s21 + $0x8] sm:$0xff] %v1256_v45 }
 0x6a5   : > { %2139 = shalt.err (!%p2136_p2)
}
 0x6a6   : > { %s2140_s22 = scalar_lea.hbm %s2692_s25, 256  ;;  %s2144_s16 = scalar_lea.hbm %s2810_s18, 2048 }
 0x6a7   : > { %p2141_p13 = scmp.ne.s32.totalorder %s2692_s25, %s2140_s22  ;;  %p2145_p6 = scmp.lt.s32.totalorder %s2692_s25, %s2810_s18 }
 0x6a8   : > { %p2146_p5 = scmp.lt.s32.totalorder %s2144_s16, %s2140_s22 }
 0x6a9   : > { %p2142_p0 = pnand %p2141_p13, %p2811_p8 }
 0x6aa   : > { %p2147_p7 = por %p2146_p5, %p2145_p6 }
 0x6ab   : > { %p2143_p1 = pneg %p2142_p0 }
 0x6ad   : > { %p2148_p4 = pnand %p2147_p7, %p2143_p1 }
 0x6af   : > { %2151 = shalt.err (!%p2148_p4)
}
 0x6b0   : > { %s2228_s14 = smov 128   ;;  %s2229_s23 = smov 8  }
 0x6b1   : > { %1754 = dma.vmem_to_hbm [thread:$0]  (%p2811_p8), %s2687_s15, 256, %s2692_s25, %s1260_s1, %s2228_s14, %s2228_s14, %s2229_s23  }
 0x6b2 PF: > { %s2812_s29 = sld [smem:[#allocation25_spill]]  ;;  %p1800_p11 = scmp.ge.s32.totalorder %s2210_s12, 2 }
 0x6b3   : > { %s2813_s9 = sld [smem:[#allocation31_spill]] }
 0x6b8   : > { %s1288_s21 = sand.u32 1, %s2812_s29  }
 0x6b9   : > { %p2814_p3 = scmp.ne.s32.totalorder %s2813_s9, 0  ;;  %s1289_s4 = scalar_lea.sflag [#allocation4], %s1288_s21 }
 0x6bb   : > { %p1786_p9 = pnand %p1800_p11, %p2814_p3 }
 0x6bd   : > { %p1787_p10 = pneg %p1786_p9 }
 0x6bf   : > { %2193 = dma.done.wait (%p1787_p10), %s1289_s4, 256  }
 0x6c0   : > { %2195 = vsyncadd (%p1787_p10), %s1289_s4, 4294967040  ;;  %s2815_s12 = sld [smem:[#allocation28_spill]]  ;;  %s2818_s30 = smov %s2202_s10 }
 0x6c1   : > { %s2816_s24 = sld [smem:[#allocation26_spill]] }
 0x6c2   : > { %s2817_s11 = sld [smem:[#allocation29_spill]] }
 0x6c6   : > { %p30_p12 = scmp.ge.s32.totalorder %s2815_s12, 10  }
 0x6c7   : > { %s2819_s10 = smov %s2816_s24 }
 0x6c8   :  { %32 = sbr.rel (!%p30_p12) target bundleno = 17 (0x11), region = 158 }
 0x6cd   :  { %1294 = vsyncpa [#allocation3], 1 }
 0x6ce   :  { %1296 = vsyncpa [#allocation3 + $0x1], 1 }
 0x6cf   :  { %1297 = vsyncpa [#allocation6], 1 }
 0x6d0   :  { %1299 = vsyncpa [#allocation6 + $0x1], 1 }
 0x6d1   :  { %1300 = vsyncpa [#allocation9], 1 }
 0x6d2   :  { %1302 = vsyncpa [#allocation9 + $0x1], 1 }
 0x6d3   :  { %1303 = vsyncpa [#allocation12], 1 }
 0x6d4   :  { %1304 = vsyncpa [#allocation15], 1 }
 0x6d5   :  { %1305 = vsyncpa [#allocation4], 1 }
 0x6d6   :  { %1307 = vsyncpa [#allocation4 + $0x1], 1 }

</bundles_post_ra>
